<compile_context>
chip_gen: v7x
topology: tpu7x:2x2x1
jax: 0.10.0
libtpu: 0.0.40
codegen_flags: <defaults>
</compile_context>

<pallas_src>
import jax
import jax.numpy as jnp
from jax.experimental import pallas as pl
from jax.experimental.pallas import tpu as pltpu


def _round_up(a, b):
    return (a + b - 1) // b * b


def _vmem_limit_bytes():
    """Adaptive per-generation VMEM budget (v5e/v6e: 128 MiB physical, v7x: 64 MiB)."""
    try:
        cap = pltpu.get_tpu_info().vmem_capacity_bytes
    except Exception:
        cap = 64 * 1024 * 1024
    return min(int(cap * 0.85), 112 * 1024 * 1024)


def prepare_params(w1, b1, w2, b2, *, compute_dtype=jnp.bfloat16):
    """One-time pad/cast of the FFN parameters (hoisted out of the forward path).

    Weights are stored (in_features, out_features) (transposed vs nn.Linear storage).
    Pads d_model / d_ffn up to multiples of 128 (lane-dense, MXU-aligned) with zeros --
    mathematically a no-op -- and casts the matmul operands to `compute_dtype`
    (bf16 default = peak-TF/s MXU path on v5e/v6e/v7x).  Biases stay f32.
    """
    d_model, d_ffn = w1.shape
    assert w2.shape == (d_ffn, d_model)
    d_model_p = _round_up(d_model, 128)
    d_ffn_p = _round_up(d_ffn, 128)

    w1p = jnp.pad(w1, ((0, d_model_p - d_model), (0, d_ffn_p - d_ffn))).astype(compute_dtype)
    w2p = jnp.pad(w2, ((0, d_ffn_p - d_ffn), (0, d_model_p - d_model))).astype(compute_dtype)
    b1p = jnp.pad(b1.reshape(1, d_ffn), ((0, 0), (0, d_ffn_p - d_ffn))).astype(jnp.float32)
    b2p = jnp.pad(b2.reshape(1, d_model), ((0, 0), (0, d_model_p - d_model))).astype(jnp.float32)

    return dict(w1=w1p, b1=b1p, w2=w2p, b2=b2p, d_model=d_model, d_ffn=d_ffn)


def _make_ffn_kernel(t_ffn, n_chunks, acc_into_out):
    def _body(x_ref, w1_ref, b1_ref, w2_ref, b2_ref, o_ref, acc_ref):
        acc_ref[...] = jnp.zeros_like(acc_ref)
        # d_ffn reduction over the VMEM-resident weights, in static 128-aligned chunks.
        for c in range(n_chunks):
            lo = c * t_ffn
            h = jnp.dot(x_ref[...], w1_ref[:, lo:lo + t_ffn],
                        preferred_element_type=jnp.float32)
            h = jnp.maximum(h + b1_ref[:, lo:lo + t_ffn], 0.0)        # bias + ReLU in f32
            acc_ref[...] += jnp.dot(h.astype(w2_ref.dtype), w2_ref[lo:lo + t_ffn, :],
                                    preferred_element_type=jnp.float32)
        # Output bias added exactly once per row tile.
        o_ref[...] = (acc_ref[...] + b2_ref[...]).astype(o_ref.dtype)

    if acc_into_out:
        # f32 output: accumulate straight into the resident output block (no scratch).
        def kernel(x_ref, w1_ref, b1_ref, w2_ref, b2_ref, o_ref):
            _body(x_ref, w1_ref, b1_ref, w2_ref, b2_ref, o_ref, o_ref)
    else:
        def kernel(x_ref, w1_ref, b1_ref, w2_ref, b2_ref, o_ref, acc_ref):
            _body(x_ref, w1_ref, b1_ref, w2_ref, b2_ref, o_ref, acc_ref)
    return kernel


def positionwise_ffn(x, params, *, tm=256, t_ffn=2048):
    """x: (batch, seq, d_model) -> (batch, seq, d_model); params from prepare_params()."""
    batch, seq, d_model = x.shape
    assert d_model == params["d_model"]
    w1p, b1p, w2p, b2p = params["w1"], params["b1"], params["w2"], params["b2"]
    d_model_p, d_ffn_p = w1p.shape
    out_dtype = x.dtype
    M = batch * seq

    # ---- row tile: multiple of 8; keep >= 2 tiles when possible (v7x megacore) ----
    tm = min(tm, _round_up(M, 8))
    if M > 8 and _round_up(M, tm) // tm < 2:
        tm = _round_up((M + 1) // 2, 8)
    M_p = _round_up(M, tm)

    # ---- d_ffn chunk: multiple of 128 that divides the (128-rounded) d_ffn ---------
    t_ffn = max(128, min(_round_up(t_ffn, 128), d_ffn_p))
    while d_ffn_p % t_ffn != 0:
        t_ffn -= 128
    n_chunks = d_ffn_p // t_ffn

    # ---- pad / cast activations (weights were prepared once, outside this call) ----
    x2 = x.reshape(M, d_model)
    if (M_p, d_model_p) != (M, d_model):
        x2 = jnp.pad(x2, ((0, M_p - M), (0, d_model_p - d_model)))
    x2 = x2.astype(w1p.dtype)

    acc_into_out = (out_dtype == jnp.float32)
    kernel = _make_ffn_kernel(t_ffn, n_chunks, acc_into_out)
    scratch = [] if acc_into_out else [pltpu.VMEM((tm, d_model_p), jnp.float32)]

    flops = 2 * 2 * M_p * d_model_p * d_ffn_p               # two matmuls
    bytes_accessed = (x2.size * x2.dtype.itemsize
                      + w1p.size * w1p.dtype.itemsize       # weights streamed exactly once
                      + w2p.size * w2p.dtype.itemsize
                      + (b1p.size + b2p.size) * 4
                      + M_p * d_model_p * jnp.dtype(out_dtype).itemsize)

    def build_call(weight_pipeline_mode):
        wkw = {} if weight_pipeline_mode is None else dict(pipeline_mode=weight_pipeline_mode)
        return pl.pallas_call(
            kernel,
            out_shape=jax.ShapeDtypeStruct((M_p, d_model_p), out_dtype),
            grid_spec=pltpu.PrefetchScalarGridSpec(
                num_scalar_prefetch=0,
                grid=(M_p // tm,),                                             # row tiles only
                in_specs=[
                    pl.BlockSpec((tm, d_model_p), lambda i: (i, 0)),           # x row tile
                    pl.BlockSpec((d_model_p, d_ffn_p), lambda i: (0, 0), **wkw),  # W1 resident
                    pl.BlockSpec((1, d_ffn_p), lambda i: (0, 0)),              # b1 resident
                    pl.BlockSpec((d_ffn_p, d_model_p), lambda i: (0, 0), **wkw),  # W2 resident
                    pl.BlockSpec((1, d_model_p), lambda i: (0, 0)),            # b2 resident
                ],
                out_specs=pl.BlockSpec((tm, d_model_p), lambda i: (i, 0)),
                scratch_shapes=scratch,
            ),
            compiler_params=pltpu.CompilerParams(
                dimension_semantics=("parallel",),
                vmem_limit_bytes=_vmem_limit_bytes(),
            ),
            cost_estimate=pl.CostEstimate(flops=flops, transcendentals=0,
                                          bytes_accessed=bytes_accessed),
        )

    try:
        # Constant-index resident weights: single-buffer them to halve their VMEM footprint
        # (matters most on v7x's 64 MiB VMEM).
        out2 = build_call(pl.Buffered(1))(x2, w1p, b1p, w2p, b2p)
    except Exception:
        # Fallback if this JAX/Mosaic build rejects buffer_count=1 for pallas_call operands.
        out2 = build_call(None)(x2, w1p, b1p, w2p, b2p)

    return out2[:M, :d_model].reshape(batch, seq, d_model)


def init_params(key, d_model, d_ffn, dtype=jnp.float32):
    """Deterministic init mimicking nn.Linear: U(-1/sqrt(fan_in), 1/sqrt(fan_in))."""
    k1, k2, k3, k4 = jax.random.split(key, 4)
    bound1 = 1.0 / (d_model ** 0.5)
    bound2 = 1.0 / (d_ffn ** 0.5)
    w1 = jax.random.uniform(k1, (d_model, d_ffn), dtype, -bound1, bound1)
    b1 = jax.random.uniform(k2, (d_ffn,), dtype, -bound1, bound1)
    w2 = jax.random.uniform(k3, (d_ffn, d_model), dtype, -bound2, bound2)
    b2 = jax.random.uniform(k4, (d_model,), dtype, -bound2, bound2)
    return w1, b1, w2, b2


if __name__ == "__main__":
    batch, seq, d_model, d_ffn = 2, 8, 32, 64
    key = jax.random.PRNGKey(0)
    kx, kp = jax.random.split(key)

    x = jax.random.normal(kx, (batch, seq, d_model), dtype=jnp.float32)
    w1, b1, w2, b2 = init_params(kp, d_model, d_ffn)

    # High-precision reference (avoid TPU default matmul-precision noise in the check).
    h_ref = jnp.maximum(jnp.dot(x, w1, precision="highest") + b1, 0.0)
    ref = jnp.dot(h_ref, w2, precision="highest") + b2

    # f32 operand path.
    params_f32 = prepare_params(w1, b1, w2, b2, compute_dtype=jnp.float32)
    out = jax.block_until_ready(positionwise_ffn(x, params_f32))
    assert out.shape == (batch, seq, d_model)
    assert jnp.allclose(out, ref, atol=5e-3, rtol=5e-3)

    # Default bf16 operand path (peak MXU throughput path): loose check.
    params_bf16 = prepare_params(w1, b1, w2, b2)
    out_bf16 = jax.block_until_ready(positionwise_ffn(x, params_bf16))
    assert jnp.allclose(out_bf16, ref, atol=5e-2, rtol=5e-2)

    # bf16 output path (exercises the f32 scratch-accumulator kernel variant).
    out_b = jax.block_until_ready(positionwise_ffn(x.astype(jnp.bfloat16), params_bf16))
    assert out_b.dtype == jnp.bfloat16
    assert jnp.allclose(out_b.astype(jnp.float32), ref, atol=5e-2, rtol=5e-2)

    print("KERNEL_OK")
</pallas_src>

<mosaic_0001>
module attributes {stable_mosaic.version = 11 : i64} {
  func.func @kernel(%arg0: i32, %arg1: memref<8x128xf32, #tpu.memory_space<vmem>>, %arg2: memref<128x128xf32, #tpu.memory_space<vmem>>, %arg3: memref<1x128xf32, #tpu.memory_space<vmem>>, %arg4: memref<128x128xf32, #tpu.memory_space<vmem>>, %arg5: memref<1x128xf32, #tpu.memory_space<vmem>>, %arg6: memref<8x128xf32, #tpu.memory_space<vmem>>) attributes {dimension_semantics = [#tpu.dimension_semantics<parallel>], iteration_bounds = array<i64: 2>, scalar_prefetch = 0 : i64, scratch_operands = 0 : i64, tpu.core_type = #tpu.core_type<tc>, window_params = [{transform_indices = @transform_0, window_bounds = array<i64: 8, 128>}, {pipeline_mode = #tpu.pipeline_mode<synchronous>, transform_indices = @transform_1, window_bounds = array<i64: 128, 128>}, {pipeline_mode = #tpu.pipeline_mode<synchronous>, transform_indices = @transform_2, window_bounds = array<i64: 1, 128>}, {pipeline_mode = #tpu.pipeline_mode<synchronous>, transform_indices = @transform_3, window_bounds = array<i64: 128, 128>}, {pipeline_mode = #tpu.pipeline_mode<synchronous>, transform_indices = @transform_4, window_bounds = array<i64: 1, 128>}, {transform_indices = @transform_5, window_bounds = array<i64: 8, 128>}]} {
    %cst = arith.constant 0.000000e+00 : f32
    %0 = vector.broadcast %cst : f32 to vector<8x128xf32>
    %c0 = arith.constant 0 : index
    %c0_0 = arith.constant 0 : index
    %1 = vector.load %arg6[%c0, %c0_0] : memref<8x128xf32, #tpu.memory_space<vmem>>, vector<8x128xf32>
    tpu.vector_store %arg6[%c0, %c0_0], %0 {strides = array<i32>} : memref<8x128xf32, #tpu.memory_space<vmem>>, vector<8x128xf32>,
    %c0_1 = arith.constant 0 : index
    %c0_2 = arith.constant 0 : index
    %2 = vector.load %arg1[%c0_1, %c0_2] : memref<8x128xf32, #tpu.memory_space<vmem>>, vector<8x128xf32>
    %c0_3 = arith.constant 0 : index
    %c0_4 = arith.constant 0 : index
    %3 = vector.load %arg2[%c0_3, %c0_4] : memref<128x128xf32, #tpu.memory_space<vmem>>, vector<128x128xf32>
    %cst_5 = arith.constant dense<0.000000e+00> : vector<8x128xf32>
    %4 = tpu.matmul %2, %3, %cst_5 {dimension_numbers = #tpu.dot_dimension_numbers<[1], [0], [0], [1], [0, 0, 1, 1], [], []>} : vector<8x128xf32>, vector<128x128xf32>, vector<8x128xf32> -> vector<8x128xf32>
    %c0_6 = arith.constant 0 : index
    %c0_7 = arith.constant 0 : index
    %5 = vector.load %arg3[%c0_6, %c0_7] : memref<1x128xf32, #tpu.memory_space<vmem>>, vector<1x128xf32>
    %6 = vector.broadcast %5 : vector<1x128xf32> to vector<8x128xf32>
    %7 = arith.addf %4, %6 : vector<8x128xf32>
    %cst_8 = arith.constant 0.000000e+00 : f32
    %8 = vector.broadcast %cst_8 : f32 to vector<8x128xf32>
    %9 = arith.maximumf %7, %8 : vector<8x128xf32>
    %c0_9 = arith.constant 0 : index
    %c0_10 = arith.constant 0 : index
    %10 = vector.load %arg6[%c0_9, %c0_10] : memref<8x128xf32, #tpu.memory_space<vmem>>, vector<8x128xf32>
    %c0_11 = arith.constant 0 : index
    %c0_12 = arith.constant 0 : index
    %11 = vector.load %arg4[%c0_11, %c0_12] : memref<128x128xf32, #tpu.memory_space<vmem>>, vector<128x128xf32>
    %cst_13 = arith.constant dense<0.000000e+00> : vector<8x128xf32>
    %12 = tpu.matmul %9, %11, %cst_13 {dimension_numbers = #tpu.dot_dimension_numbers<[1], [0], [0], [1], [0, 0, 1, 1], [], []>} : vector<8x128xf32>, vector<128x128xf32>, vector<8x128xf32> -> vector<8x128xf32>
    %13 = arith.addf %10, %12 : vector<8x128xf32>
    %c0_14 = arith.constant 0 : index
    %c0_15 = arith.constant 0 : index
    %14 = vector.load %arg6[%c0_14, %c0_15] : memref<8x128xf32, #tpu.memory_space<vmem>>, vector<8x128xf32>
    tpu.vector_store %arg6[%c0_14, %c0_15], %13 {strides = array<i32>} : memref<8x128xf32, #tpu.memory_space<vmem>>, vector<8x128xf32>,
    %c0_16 = arith.constant 0 : index
    %c0_17 = arith.constant 0 : index
    %15 = vector.load %arg6[%c0_16, %c0_17] : memref<8x128xf32, #tpu.memory_space<vmem>>, vector<8x128xf32>
    %c0_18 = arith.constant 0 : index
    %c0_19 = arith.constant 0 : index
    %16 = vector.load %arg5[%c0_18, %c0_19] : memref<1x128xf32, #tpu.memory_space<vmem>>, vector<1x128xf32>
    %17 = vector.broadcast %16 : vector<1x128xf32> to vector<8x128xf32>
    %18 = arith.addf %15, %17 : vector<8x128xf32>
    %c0_20 = arith.constant 0 : index
    %c0_21 = arith.constant 0 : index
    %19 = vector.load %arg6[%c0_20, %c0_21] : memref<8x128xf32, #tpu.memory_space<vmem>>, vector<8x128xf32>
    tpu.vector_store %arg6[%c0_20, %c0_21], %18 {strides = array<i32>} : memref<8x128xf32, #tpu.memory_space<vmem>>, vector<8x128xf32>,
    return
  }
  func.func @transform_0(%arg0: i32) -> (i32, i32) {
    %c0_i32 = arith.constant 0 : i32
    %c0_i32_0 = arith.constant 0 : i32
    return %arg0, %c0_i32 : i32, i32
  }
  func.func @transform_1(%arg0: i32) -> (i32, i32) {
    %c0_i32 = arith.constant 0 : i32
    %c0_i32_0 = arith.constant 0 : i32
    %c0_i32_1 = arith.constant 0 : i32
    return %c0_i32, %c0_i32_0 : i32, i32
  }
  func.func @transform_2(%arg0: i32) -> (i32, i32) {
    %c0_i32 = arith.constant 0 : i32
    %c0_i32_0 = arith.constant 0 : i32
    %c0_i32_1 = arith.constant 0 : i32
    return %c0_i32, %c0_i32_0 : i32, i32
  }
  func.func @transform_3(%arg0: i32) -> (i32, i32) {
    %c0_i32 = arith.constant 0 : i32
    %c0_i32_0 = arith.constant 0 : i32
    %c0_i32_1 = arith.constant 0 : i32
    return %c0_i32, %c0_i32_0 : i32, i32
  }
  func.func @transform_4(%arg0: i32) -> (i32, i32) {
    %c0_i32 = arith.constant 0 : i32
    %c0_i32_0 = arith.constant 0 : i32
    %c0_i32_1 = arith.constant 0 : i32
    return %c0_i32, %c0_i32_0 : i32, i32
  }
  func.func @transform_5(%arg0: i32) -> (i32, i32) {
    %c0_i32 = arith.constant 0 : i32
    %c0_i32_0 = arith.constant 0 : i32
    return %arg0, %c0_i32 : i32, i32
  }
}

module attributes {stable_mosaic.version = 11 : i64} {
  func.func @kernel(%arg0: i32, %arg1: memref<8x128xf32, #tpu.memory_space<vmem>>, %arg2: memref<128x128xf32, #tpu.memory_space<vmem>>, %arg3: memref<1x128xf32, #tpu.memory_space<vmem>>, %arg4: memref<128x128xf32, #tpu.memory_space<vmem>>, %arg5: memref<1x128xf32, #tpu.memory_space<vmem>>, %arg6: memref<8x128xf32, #tpu.memory_space<vmem>>) attributes {dimension_semantics = [#tpu.dimension_semantics<parallel>], iteration_bounds = array<i64: 2>, scalar_prefetch = 0 : i64, scratch_operands = 0 : i64, tpu.core_type = #tpu.core_type<tc>, window_params = [{transform_indices = @transform_0, window_bounds = array<i64: 8, 128>}, {pipeline_mode = #tpu.pipeline_mode<synchronous>, transform_indices = @transform_1, window_bounds = array<i64: 128, 128>}, {pipeline_mode = #tpu.pipeline_mode<synchronous>, transform_indices = @transform_2, window_bounds = array<i64: 1, 128>}, {pipeline_mode = #tpu.pipeline_mode<synchronous>, transform_indices = @transform_3, window_bounds = array<i64: 128, 128>}, {pipeline_mode = #tpu.pipeline_mode<synchronous>, transform_indices = @transform_4, window_bounds = array<i64: 1, 128>}, {transform_indices = @transform_5, window_bounds = array<i64: 8, 128>}]} {
    %cst = arith.constant 0.000000e+00 : f32
    %0 = vector.broadcast %cst : f32 to vector<8x128xf32>
    %c0 = arith.constant 0 : index
    %c0_0 = arith.constant 0 : index
    %1 = vector.load %arg6[%c0, %c0_0] : memref<8x128xf32, #tpu.memory_space<vmem>>, vector<8x128xf32>
    tpu.vector_store %arg6[%c0, %c0_0], %0 {strides = array<i32>} : memref<8x128xf32, #tpu.memory_space<vmem>>, vector<8x128xf32>,
    %c0_1 = arith.constant 0 : index
    %c0_2 = arith.constant 0 : index
    %2 = vector.load %arg1[%c0_1, %c0_2] : memref<8x128xf32, #tpu.memory_space<vmem>>, vector<8x128xf32>
    %c0_3 = arith.constant 0 : index
    %c0_4 = arith.constant 0 : index
    %3 = vector.load %arg2[%c0_3, %c0_4] : memref<128x128xf32, #tpu.memory_space<vmem>>, vector<128x128xf32>
    %cst_5 = arith.constant dense<0.000000e+00> : vector<8x128xf32>
    %4 = tpu.matmul %2, %3, %cst_5 {dimension_numbers = #tpu.dot_dimension_numbers<[1], [0], [0], [1], [0, 0, 1, 1], [], []>} : vector<8x128xf32>, vector<128x128xf32>, vector<8x128xf32> -> vector<8x128xf32>
    %c0_6 = arith.constant 0 : index
    %c0_7 = arith.constant 0 : index
    %5 = vector.load %arg3[%c0_6, %c0_7] : memref<1x128xf32, #tpu.memory_space<vmem>>, vector<1x128xf32>
    %6 = vector.broadcast %5 : vector<1x128xf32> to vector<8x128xf32>
    %7 = arith.addf %4, %6 : vector<8x128xf32>
    %cst_8 = arith.constant 0.000000e+00 : f32
    %8 = vector.broadcast %cst_8 : f32 to vector<8x128xf32>
    %9 = arith.maximumf %7, %8 : vector<8x128xf32>
    %c0_9 = arith.constant 0 : index
    %c0_10 = arith.constant 0 : index
    %10 = vector.load %arg6[%c0_9, %c0_10] : memref<8x128xf32, #tpu.memory_space<vmem>>, vector<8x128xf32>
    %c0_11 = arith.constant 0 : index
    %c0_12 = arith.constant 0 : index
    %11 = vector.load %arg4[%c0_11, %c0_12] : memref<128x128xf32, #tpu.memory_space<vmem>>, vector<128x128xf32>
    %cst_13 = arith.constant dense<0.000000e+00> : vector<8x128xf32>
    %12 = tpu.matmul %9, %11, %cst_13 {dimension_numbers = #tpu.dot_dimension_numbers<[1], [0], [0], [1], [0, 0, 1, 1], [], []>} : vector<8x128xf32>, vector<128x128xf32>, vector<8x128xf32> -> vector<8x128xf32>
    %13 = arith.addf %10, %12 : vector<8x128xf32>
    %c0_14 = arith.constant 0 : index
    %c0_15 = arith.constant 0 : index
    %14 = vector.load %arg6[%c0_14, %c0_15] : memref<8x128xf32, #tpu.memory_space<vmem>>, vector<8x128xf32>
    tpu.vector_store %arg6[%c0_14, %c0_15], %13 {strides = array<i32>} : memref<8x128xf32, #tpu.memory_space<vmem>>, vector<8x128xf32>,
    %c0_16 = arith.constant 0 : index
    %c0_17 = arith.constant 0 : index
    %15 = vector.load %arg6[%c0_16, %c0_17] : memref<8x128xf32, #tpu.memory_space<vmem>>, vector<8x128xf32>
    %c0_18 = arith.constant 0 : index
    %c0_19 = arith.constant 0 : index
    %16 = vector.load %arg5[%c0_18, %c0_19] : memref<1x128xf32, #tpu.memory_space<vmem>>, vector<1x128xf32>
    %17 = vector.broadcast %16 : vector<1x128xf32> to vector<8x128xf32>
    %18 = arith.addf %15, %17 : vector<8x128xf32>
    %c0_20 = arith.constant 0 : index
    %c0_21 = arith.constant 0 : index
    %19 = vector.load %arg6[%c0_20, %c0_21] : memref<8x128xf32, #tpu.memory_space<vmem>>, vector<8x128xf32>
    tpu.vector_store %arg6[%c0_20, %c0_21], %18 {strides = array<i32>} : memref<8x128xf32, #tpu.memory_space<vmem>>, vector<8x128xf32>,
    return
  }
  func.func @transform_0(%arg0: i32) -> (i32, i32) {
    %c0_i32 = arith.constant 0 : i32
    %c0_i32_0 = arith.constant 0 : i32
    return %arg0, %c0_i32 : i32, i32
  }
  func.func @transform_1(%arg0: i32) -> (i32, i32) {
    %c0_i32 = arith.constant 0 : i32
    %c0_i32_0 = arith.constant 0 : i32
    %c0_i32_1 = arith.constant 0 : i32
    return %c0_i32, %c0_i32_0 : i32, i32
  }
  func.func @transform_2(%arg0: i32) -> (i32, i32) {
    %c0_i32 = arith.constant 0 : i32
    %c0_i32_0 = arith.constant 0 : i32
    %c0_i32_1 = arith.constant 0 : i32
    return %c0_i32, %c0_i32_0 : i32, i32
  }
  func.func @transform_3(%arg0: i32) -> (i32, i32) {
    %c0_i32 = arith.constant 0 : i32
    %c0_i32_0 = arith.constant 0 : i32
    %c0_i32_1 = arith.constant 0 : i32
    return %c0_i32, %c0_i32_0 : i32, i32
  }
  func.func @transform_4(%arg0: i32) -> (i32, i32) {
    %c0_i32 = arith.constant 0 : i32
    %c0_i32_0 = arith.constant 0 : i32
    %c0_i32_1 = arith.constant 0 : i32
    return %c0_i32, %c0_i32_0 : i32, i32
  }
  func.func @transform_5(%arg0: i32) -> (i32, i32) {
    %c0_i32 = arith.constant 0 : i32
    %c0_i32_0 = arith.constant 0 : i32
    return %arg0, %c0_i32 : i32, i32
  }
}

</mosaic_0001>

<bundles_post_ra>
// kernel: tpu_custom_call.1
= control target key start
LH: loop header
LB: loop body
LE: loop exit
PB: predicated region body
PF: predicated region fallthrough
CT: control target
= control target key end

     0   :  { %10 = vsyncpa [#allocation3], 0  ;;  %s1264_s0 = inlined_call_operand.hbm [shape: f32[16,128], index: 0, kind: input, shape index: {}]   ;;  %s1265_s1 = inlined_call_operand.hbm [shape: f32[128,128], index: 1, kind: input, shape index: {}]   ;;  %s1266_s2 = inlined_call_operand.vmem [shape: f32[1,128], index: 2, kind: input, shape index: {}]   ;;  %s1267_s3 = inlined_call_operand.hbm [shape: f32[128,128], index: 3, kind: input, shape index: {}]   ;;  %s1268_s4 = inlined_call_operand.vmem [shape: f32[1,128], index: 4, kind: input, shape index: {}]   ;;  %s1269_s5 = inlined_call_operand.hbm [shape: f32[16,128], index: 5, kind: output, shape index: {}]  }
   0x1   :  { %12 = vsyncpa [#allocation3 + $0x1], 0 }
   0x2   :  { %13 = vsyncpa [#allocation6], 0 }
   0x3   :  { %14 = vsyncpa [#allocation4], 0 }
   0x4   :  { %16 = vsyncpa [#allocation4 + $0x1], 0  ;;  %s1006_s18 = smov 0   ;;  %s1008_s19 = smov 0  }
   0x5   :  { %s1010_s20 = smov 0   ;;  %s1012_s21 = smov 0  }
   0x6 LB: > { %s1027_s22 = sadd.s32 4294967295, %s965_s21   ;;  %s567_s23 = sadd.s32 4294967294, %s965_s21   ;;  %s965_s21 = sphi %s1012_s21, %s1289_s21   ;;  %s961_s20 = sphi %s1010_s20, %s1288_s20   ;;  %s957_s19 = sphi %s1008_s19, %s1287_s19   ;;  %s953_s18 = sphi %s1006_s18, %s1286_s18  }
   0x7   : > { %p42_p0 = scmp.ne.s32.totalorder %s957_s19, %s953_s18  ;;  %p1270_p1 = scmp.eq.s32.totalorder %s1027_s22, 0 }
   0x8   : > { %p156_p3 = scmp.eq.s32.totalorder %s567_s23, 1  ;;  %p568_p5 = scmp.ge.s32.totalorder %s965_s21, 1 }
   0x9   : > { %p1036_p4 = por %p1270_p1, %p42_p0  ;;  %p163_p7 = scmp.lt.s32.totalorder %s965_s21, 3 }
   0xa   : > { %p1041_p6 = por %p156_p3, %p42_p0  ;;  %s967_s27 = smov [#allocation5]  }
   0xb   : > { %s1273_s24 = scalar_select %p1036_p4, 1, 0 }
   0xc   : > { %s1274_s25 = scalar_select %p1041_p6, 1, 0 }
   0xd   : > { %p1046_p8 = pnand %p568_p5, %p163_p7  ;;  %s175_s28 = sshll.u32 %s967_s27, 4  ;;  %s1050_s28 = int_to_ptr.vmem [resolvable:$true] %s175_s28 }
   0xe   : > { %s968_s30 = smov [#allocation7]   ;;  %s809_s9 = scalar_lea.hbm %s1265_s1, 2048 }
   0xf   : > { %p749_p9 = pneg %p1046_p8  ;;  %s191_s6 = sshll.u32 %s968_s30, 4  ;;  %s1061_s6 = int_to_ptr.vmem [resolvable:$true] %s191_s6 }
  0x10   : > { %p810_p12 = scmp.ne.s32.totalorder %s1265_s1, %s809_s9  ;;  %p816_p5 = scmp.lt.u32.totalorder %s809_s9, %s1265_s1 }
  0x11   : > { %p1057_p11 = pnand %p749_p9, %p1270_p1 }
  0x13   : > { %p811_p13 = pneg %p1057_p11 }
  0x15   : > { %p812_p0 = pnand %p811_p13, %p810_p12 }
  0x17   : > { %p813_p3 = pneg %p812_p0 }
  0x19   : > { %p818_p7 = pnand %p816_p5, %p813_p3 }
  0x1b   : > { %821 = shalt.err (!%p818_p7)
}
  0x1c   : > { %s822_s14 = scalar_lea.vmem %s1050_s28, 2048  ;;  %p830_p2 = scmp.lt.s32.totalorder %s1050_s28, %s1050_s28 }
  0x1d   : > { %p823_p9 = scmp.ne.s32.totalorder %s1050_s28, %s822_s14  ;;  %p831_p12 = scmp.lt.s32.totalorder %s822_s14, %s822_s14 }
  0x1f   : > { %p825_p10 = pnand %p823_p9, %p811_p13  ;;  %p832_p0 = por %p831_p12, %p830_p2 }
  0x21   : > { %p826_p1 = pneg %p825_p10 }
  0x23   : > { %p833_p6 = pnand %p832_p0, %p826_p1 }
  0x25   : > { %836 = shalt.err (!%p833_p6)
}
  0x26   : > { %s969_s15 = smov 128   ;;  %s970_s16 = smov 8  }
  0x27   : > { %752 = dma.hbm_to_vmem [thread:$0]  (!%p1057_p11), %s1265_s1, 2048, %s1050_s28, [#allocation6], %s969_s15, %s969_s15, %s970_s16  }
  0x28   : > { %s837_s7 = scalar_lea.hbm %s1267_s3, 2048 }
  0x29   : > { %p838_p2 = scmp.ne.s32.totalorder %s1267_s3, %s837_s7  ;;  %p844_p10 = scmp.lt.u32.totalorder %s837_s7, %s1267_s3 }
  0x2b   : > { %p840_p1 = pnand %p838_p2, %p811_p13 }
  0x2d   : > { %p841_p6 = pneg %p840_p1 }
  0x2f   : > { %p846_p3 = pnand %p844_p10, %p841_p6 }
  0x31   : > { %849 = shalt.err (!%p846_p3)
}
  0x32   : > { %s850_s28 = scalar_lea.vmem %s1061_s6, 2048  ;;  %p858_p12 = scmp.lt.s32.totalorder %s1061_s6, %s1061_s6 }
  0x33   : > { %p851_p5 = scmp.ne.s32.totalorder %s1061_s6, %s850_s28  ;;  %p859_p0 = scmp.lt.s32.totalorder %s850_s28, %s850_s28 }
  0x35   : > { %p853_p7 = pnand %p851_p5, %p811_p13  ;;  %p860_p2 = por %p859_p0, %p858_p12 }
  0x37   : > { %p854_p9 = pneg %p853_p7 }
  0x39   : > { %p861_p1 = pnand %p860_p2, %p854_p9 }
  0x3b   : > { %864 = shalt.err (!%p861_p1)
}
  0x3c   : > { %755 = dma.hbm_to_vmem [thread:$0]  (!%p1057_p11), %s1267_s3, 2048, %s1061_s6, [#allocation6], %s969_s15, %s969_s15, %s970_s16  }
  0x3d   : > { %s1116_s14 = sadd.s32 1, %s965_s21   ;;  %s29_s29 = sadd.s32 1, %s961_s20 }
  0x3e   : > { %s26_s17 = ssub.s32 %s965_s21, %s1116_s14  ;;  %p36_p13 = scmp.ne.s32.totalorder %s961_s20, %s957_s19 }
  0x3f   : > { %p27_p6 = scmp.eq.s32.totalorder %s26_s17, 0  ;;  %p37_p10 = scmp.eq.s32.totalorder %s965_s21, 0 }
  0x40   : > { %p1277_p3 = scmp.eq.s32.totalorder %s1027_s22, 1  ;;  %p766_p7 = scmp.lt.s32.totalorder %s965_s21, 2 }
  0x41   : > { %s1132_s27 = scalar_select %p27_p6, %s961_s20, %s29_s29  }
  0x42   : > { %p1126_p5 = por %p1277_p3, %p36_p13  ;;  %p38_p9 = por %p37_p10, %p36_p13 }
  0x43   : > { %s208_s30 = sand.u32 1, %s961_s20   ;;  %s573_s6 = sshll.u32 %s965_s21, 7 }
  0x44   : > { %s1278_s23 = scalar_select %p1126_p5, 1, 0 }
  0x45   : > { %s572_s7 = sshll.u32 %s208_s30, 3  ;;  %s1139_s8 = scalar_lea.hbm %s1264_s0, %s573_s6 }
  0x46   : > { %s212_s9 = scalar_lea.vmem [#allocation2], %s572_s7  ;;  %p1143_p11 = pnand %p766_p7, %p38_p9 }
  0x47   : > { %s219_s10 = sshll.u32 %s212_s9, 4  ;;  %s209_s28 = scalar_lea.sflag [#allocation3], %s208_s30  ;;  %s1141_s10 = int_to_ptr.vmem [resolvable:$true] %s219_s10 }
  0x48   : > { %s865_s12 = scalar_lea.hbm %s1139_s8, 128  ;;  %p867_p0 = pneg %p1143_p11 }
  0x49   : > { %p866_p12 = scmp.ne.s32.totalorder %s1139_s8, %s865_s12  ;;  %s870_s17 = scalar_lea.hbm %s1264_s0, 256 }
  0x4a   : > { %p871_p13 = scmp.lt.u32.totalorder %s1139_s8, %s1264_s0  ;;  %p872_p6 = scmp.lt.u32.totalorder %s870_s17, %s865_s12 }
  0x4b   : > { %p868_p2 = pnand %p867_p0, %p866_p12  ;;  %p874_p3 = scmp.lt.u32.totalorder %s865_s12, %s1139_s8 }
  0x4c   : > { %p873_p10 = por %p872_p6, %p871_p13 }
  0x4d   : > { %p869_p1 = pneg %p868_p2 }
  0x4e   : > { %p875_p7 = por %p874_p3, %p873_p10 }
  0x50   : > { %p876_p9 = pnand %p875_p7, %p869_p1 }
  0x52   : > { %879 = shalt.err (!%p876_p9)
}
  0x53   : > { %s880_s30 = scalar_lea.vmem %s1141_s10, 128  ;;  %s971_s15 = smov [#allocation2]  }
  0x54   : > { %p881_p12 = scmp.ne.s32.totalorder %s1141_s10, %s880_s30  ;;  %s885_s16 = sshll.u32 %s971_s15, 4  ;;  %s886_s16 = int_to_ptr.vmem [resolvable:$false] %s885_s16 }
  0x55   : > { %s887_s9 = scalar_lea.vmem %s886_s16, 256  ;;  %p888_p4 = scmp.lt.s32.totalorder %s1141_s10, %s886_s16 }
  0x56   : > { %p883_p2 = pnand %p881_p12, %p867_p0  ;;  %p889_p13 = scmp.lt.s32.totalorder %s887_s9, %s880_s30 }
  0x58   : > { %p884_p5 = pneg %p883_p2  ;;  %p890_p6 = por %p889_p13, %p888_p4 }
  0x5a   : > { %p891_p10 = pnand %p890_p6, %p884_p5 }
  0x5c   : > { %894 = shalt.err (!%p891_p10)
}
  0x5d   : > { %759 = dma.hbm_to_vmem [thread:$0]  (!%p1143_p11), %s1139_s8, 128, %s1141_s10, %s209_s28  }
  0x5e   : > { %228 = sbr.rel (%p1046_p8) target bundleno = 583 (0x247), region = 40  ;;  %s1175_s12 = sand.u32 (!%p1046_p8), 1, %s957_s19  }
  0x5f   : > { %s575_s13 = sshll.u32 (!%p1046_p8), %s1175_s12, 3  ;;  %s231_s29 = scalar_lea.sflag (!%p1046_p8), [#allocation3], %s1175_s12 }
  0x60   : > { %s1181_s17 = scalar_lea.vmem (!%p1046_p8), [#allocation2], %s575_s13  ;;  %p1280_p4 = scmp.ne.s32.totalorder (!%p1046_p8), %s1273_s24, 0 }
  0x65   : > { %940 = dma.done.wait (%p1280_p4), %s231_s29, 128  }
  0x66   : > { %942 = vsyncadd (%p1280_p4), %s231_s29, 4294967168  ;;  %p1281_p5 = scmp.eq.s32.totalorder %s1027_s22, 0 }
  0x68   : > { %944 = dma.done.wait (%p1281_p5), [#allocation6], 4096   ;;  %p1282_p8 = pmov %p1281_p5 }
  0x69   : > { %v972_v0 = vmov 0.0|0.0   ;;  %vm973_vm0 = vmmov 0   ;;  %v974_v1 = vmov 0.0   ;;  %v271_v2 = vld [vmem:[#allocation5] sm:$0xff]  ;;  %v272_v3 = vld [vmem:[#allocation5 + $0x8] sm:$0xff]  ;;  %v273_v4 = vld [vmem:[#allocation5 + $0x10] sm:$0xff] }
  0x6a   : > { %946 = vsyncadd (%p1282_p8), [#allocation6], 4294963200  ;;  %689 = vmatprep.subr.bf16.mxu0 %v972_v0  ;;  %651 = vmatprep.mubr.msk.f32.mxu0 %vm973_vm0, %v974_v1  ;;  %v690_v5 = vpack.c.bf16 %v272_v3, %v271_v2  ;;  %v274_v6 = vld [vmem:[#allocation5 + $0x18] sm:$0xff]  ;;  %v275_v8 = vld [vmem:[#allocation5 + $0x20] sm:$0xff]  ;;  %s582_s11 = sshll.u32 %s1027_s22, 7  ;;  %s268_s28 = scalar_lea.vmem [#allocation8], %s575_s13 }
  0x6b   : > { %713 = vmatprep.subr.bf16.mxu1 %v972_v0  ;;  %686 = vmatprep.mubr.msk.f32.mxu1 %vm973_vm0, %v974_v1  ;;  %v693_v7 = vpack.c.bf16 %v274_v6, %v273_v4  ;;  %v276_v9 = vld [vmem:[#allocation5 + $0x28] sm:$0xff]  ;;  %v366_v10 = vld [vmem:[#allocation7] sm:$0xff]  ;;  %v368_v12 = vld [vmem:[#allocation7 + $0x10] sm:$0xff]  ;;  %s478_s7 = sshll.u32 %s268_s28, 4  ;;  %s1220_s15 = scalar_lea.hbm %s1269_s5, %s582_s11  ;;  %s1222_s7 = int_to_ptr.vmem [resolvable:$true] %s478_s7 }
  0x6c   : > { %691 = vmatpush3.bf16.msra.mxu0 %v690_v5  ;;  %v367_v11 = vld [vmem:[#allocation7 + $0x8] sm:$0xff]  ;;  %v369_v13 = vld [vmem:[#allocation7 + $0x18] sm:$0xff]  ;;  %v696_v14 = vpack.c.bf16 %v276_v9, %v275_v8  ;;  %v277_v16 = vld [vmem:[#allocation5 + $0x30] sm:$0xff]  ;;  %s465_s16 = scalar_lea.sflag [#allocation4], %s1175_s12  ;;  %s895_s9 = scalar_lea.vmem %s1222_s7, 128 }
  0x6d   : > { %692 = vmatprep.subr.bf16.mxu0 %v972_v0  ;;  %v714_v15 = vpack.c.bf16 %v367_v11, %v366_v10  ;;  %v278_v17 = vld [vmem:[#allocation5 + $0x38] sm:$0xff]  ;;  %v717_v18 = vpack.c.bf16 %v369_v13, %v368_v12  ;;  %v370_v19 = vld [vmem:[#allocation7 + $0x20] sm:$0xff]  ;;  %v371_v20 = vld [vmem:[#allocation7 + $0x28] sm:$0xff]  ;;  %p896_p11 = scmp.ne.s32.totalorder %s1222_s7, %s895_s9  ;;  %p1283_p0 = scmp.ne.s32.totalorder %s1278_s23, 0 }
  0x6e   : > { %v699_v21 = vpack.c.bf16 %v278_v17, %v277_v16  ;;  %v279_v22 = vld [vmem:[#allocation5 + $0x40] sm:$0xff]  ;;  %v280_v23 = vld [vmem:[#allocation5 + $0x48] sm:$0xff]  ;;  %v720_v24 = vpack.c.bf16 %v371_v20, %v370_v19  ;;  %v372_v25 = vld [vmem:[#allocation7 + $0x30] sm:$0xff]  ;;  %s975_s22 = smov [#allocation8]  }
  0x6f   : > { %715 = vmatpush3.bf16.msra.mxu1 %v714_v15  ;;  %v373_v26 = vld [vmem:[#allocation7 + $0x38] sm:$0xff]  ;;  %v702_v27 = vpack.c.bf16 %v280_v23, %v279_v22  ;;  %v281_v28 = vld [vmem:[#allocation5 + $0x50] sm:$0xff]  ;;  %v374_v31 = vld [vmem:[#allocation7 + $0x40] sm:$0xff]  ;;  %p897_p1 = pnand %p896_p11, %p1283_p0  ;;  %s899_s13 = sshll.u32 %s975_s22, 4  ;;  %s900_s13 = int_to_ptr.vmem [resolvable:$false] %s899_s13 }
  0x70   : > { %694 = vmatpush3.bf16.msra.mxu0 %v693_v7  ;;  %716 = vmatprep.subr.bf16.mxu1 %v972_v0  ;;  %v282_v29 = vld [vmem:[#allocation5 + $0x58] sm:$0xff]  ;;  %v723_v30 = vpack.c.bf16 %v373_v26, %v372_v25  ;;  %v375_v32 = vld [vmem:[#allocation7 + $0x48] sm:$0xff]  ;;  %v283_v34 = vld [vmem:[#allocation5 + $0x60] sm:$0xff]  ;;  %s901_s29 = scalar_lea.vmem %s900_s13, 256  ;;  %p902_p7 = scmp.lt.s32.totalorder %s1222_s7, %s900_s13 }
  0x71   : > { %695 = vmatprep.subr.bf16.mxu0 %v972_v0  ;;  %v705_v33 = vpack.c.bf16 %v282_v29, %v281_v28  ;;  %v284_v35 = vld [vmem:[#allocation5 + $0x68] sm:$0xff]  ;;  %v726_v36 = vpack.c.bf16 %v375_v32, %v374_v31  ;;  %v376_v37 = vld [vmem:[#allocation7 + $0x50] sm:$0xff]  ;;  %v377_v38 = vld [vmem:[#allocation7 + $0x58] sm:$0xff]  ;;  %p898_p3 = pneg %p897_p1  ;;  %p903_p9 = scmp.lt.s32.totalorder %s901_s29, %s895_s9 }
  0x72   : > { %v708_v39 = vpack.c.bf16 %v284_v35, %v283_v34  ;;  %v285_v40 = vld [vmem:[#allocation5 + $0x70] sm:$0xff]  ;;  %v286_v41 = vld [vmem:[#allocation5 + $0x78] sm:$0xff]  ;;  %v729_v42 = vpack.c.bf16 %v377_v38, %v376_v37  ;;  %v378_v43 = vld [vmem:[#allocation7 + $0x60] sm:$0xff] }
  0x73   : > { %718 = vmatpush3.bf16.msra.mxu1 %v717_v18  ;;  %v379_v44 = vld [vmem:[#allocation7 + $0x68] sm:$0xff]  ;;  %v711_v45 = vpack.c.bf16 %v286_v41, %v285_v40  ;;  %v270_v47 = vld [vmem:[%s1181_s17] sm:$0xff]  ;;  %p904_p12 = por %p903_p9, %p902_p7 }
  0x74   : > { %697 = vmatpush3.bf16.msra.mxu0 %v696_v14  ;;  %719 = vmatprep.subr.bf16.mxu1 %v972_v0  ;;  %v732_v46 = vpack.c.bf16 %v379_v44, %v378_v43  ;;  %v380_v48 = vld [vmem:[#allocation7 + $0x70] sm:$0xff]  ;;  %v381_v49 = vld [vmem:[#allocation7 + $0x78] sm:$0xff] }
  0x75   : > { %698 = vmatprep.subr.bf16.mxu0 %v972_v0  ;;  %v735_v50 = vpack.c.bf16 %v381_v49, %v380_v48  ;;  %v579_v51 = vld [vmem:[%s1266_s2] ss:$0 sm:$0xff]  ;;  %p905_p2 = pnand %p904_p12, %p898_p3 }
  0x76   : > { %v580_v57 = vld [vmem:[%s1268_s4] ss:$0 sm:$0xff] }
  0x77   : > { %721 = vmatpush3.bf16.msra.mxu1 %v720_v24 }
  0x78   : > { %700 = vmatpush3.bf16.msra.mxu0 %v699_v21  ;;  %722 = vmatprep.subr.bf16.mxu1 %v972_v0 }
  0x79   : > { %701 = vmatprep.subr.bf16.mxu0 %v972_v0 }
  0x7b   : > { %724 = vmatpush3.bf16.msra.mxu1 %v723_v30 }
  0x7c   : > { %703 = vmatpush3.bf16.msra.mxu0 %v702_v27  ;;  %725 = vmatprep.subr.bf16.mxu1 %v972_v0 }
  0x7d   : > { %704 = vmatprep.subr.bf16.mxu0 %v972_v0 }
  0x7f   : > { %727 = vmatpush3.bf16.msra.mxu1 %v726_v36 }
  0x80   : > { %706 = vmatpush3.bf16.msra.mxu0 %v705_v33  ;;  %728 = vmatprep.subr.bf16.mxu1 %v972_v0 }
  0x81   : > { %707 = vmatprep.subr.bf16.mxu0 %v972_v0 }
  0x83   : > { %730 = vmatpush3.bf16.msra.mxu1 %v729_v42 }
  0x84   : > { %709 = vmatpush3.bf16.msra.mxu0 %v708_v39  ;;  %731 = vmatprep.subr.bf16.mxu1 %v972_v0 }
  0x85   : > { %710 = vmatprep.subr.bf16.mxu0 %v972_v0 }
  0x87   : > { %733 = vmatpush3.bf16.msra.mxu1 %v732_v46 }
  0x88   : > { %712 = vmatpush3.bf16.msra.mxu0 %v711_v45  ;;  %734 = vmatprep.subr.bf16.mxu1 %v972_v0 }
  0x8b   : > { %652 = vmatmul.mubr.f32.vlgmr.msra.gmra.mrb[0].mxu0 %v270_v47  ;;  %736 = vmatpush3.bf16.msra.mxu1 %v735_v50 }
 0x15e   : > { %v360_v52 = vpop.f32.mrb[0].mxu0 }
 0x15f   : > { %v361_v53 = vadd.f32 %v579_v51, %v360_v52  ;;  %v653_v54 = vpop.f32.mrb[1].mxu0 }
 0x161   : > { %v364_v55 = vmax.f32 %v361_v53, 0.0 }
 0x163   : > { %687 = vmatmul.mubr.f32.vlgmr.msra.gmra.mrb[0].mxu1 %v364_v55 }
 0x236   : > { %v448_v56 = vpop.f32.mrb[0].mxu1 }
 0x237   : > { %v688_v58 = vpop.f32.mrb[1].mxu1  ;;  %v462_v59 = vadd.f32 %v580_v57, %v448_v56 }
 0x239   : > { %463 = vst [vmem:[%s268_s28] sm:$0xff] %v462_v59 }
 0x23a   : > { %908 = shalt.err (!%p905_p2)
}
 0x23b   : > { %s909_s12 = scalar_lea.hbm %s1220_s15, 128  ;;  %s913_s26 = scalar_lea.hbm %s1269_s5, 256 }
 0x23c   : > { %p910_p13 = scmp.ne.s32.totalorder %s1220_s15, %s909_s12  ;;  %p914_p4 = scmp.lt.u32.totalorder %s1220_s15, %s1269_s5 }
 0x23d   : > { %p915_p5 = scmp.lt.u32.totalorder %s913_s26, %s909_s12  ;;  %p917_p11 = scmp.lt.u32.totalorder %s909_s12, %s1220_s15 }
 0x23e   : > { %p911_p6 = pnand %p910_p13, %p1283_p0 }
 0x23f   : > { %p916_p8 = por %p915_p5, %p914_p4 }
 0x240   : > { %p912_p10 = pneg %p911_p6 }
 0x241   : > { %p918_p1 = por %p917_p11, %p916_p8 }
 0x243   : > { %p919_p3 = pnand %p918_p1, %p912_p10 }
 0x245   : > { %922 = shalt.err (!%p919_p3)
}
 0x246   : > { %747 = dma.vmem_to_hbm [thread:$0]  (%p1283_p0), %s1222_s7, 128, %s1220_s15, %s465_s16  }
 0x247 PF: > { %s490_s11 = sand.u32 1, %s953_s18   ;;  %p1284_p7 = scmp.ne.s32.totalorder %s1274_s25, 0 }
 0x248   : > { %p1285_p9 = scmp.ge.s32.totalorder %s965_s21, 2  ;;  %s491_s28 = scalar_lea.sflag [#allocation4], %s490_s11 }
 0x24a   : > { %p761_p12 = pnand %p1285_p9, %p1284_p7 }
 0x24c   : > { %948 = dma.done.wait (!%p761_p12), %s491_s28, 128  }
 0x24d   : > { %950 = vsyncadd (!%p761_p12), %s491_s28, 4294967168  ;;  %p19_p2 = scmp.ge.s32.totalorder %s1116_s14, 4   ;;  %s1286_s18 = smov %s957_s19 }
 0x24e   : > { %s1287_s19 = smov %s961_s20  ;;  %s1288_s20 = smov %s1132_s27 }
 0x24f   : > { %s1289_s21 = smov %s1116_s14  ;;  %21 = sbr.rel (!%p19_p2) target bundleno = 6 (0x6), region = 93 }
 0x256   :  { %496 = vsyncpa [#allocation3], 1 }
 0x257   :  { %498 = vsyncpa [#allocation3 + $0x1], 1 }
 0x258   :  { %499 = vsyncpa [#allocation6], 1 }
 0x259   :  { %500 = vsyncpa [#allocation4], 1 }
 0x25a   :  { %502 = vsyncpa [#allocation4 + $0x1], 1 }

// kernel: tpu_custom_call.1
= control target key start
LH: loop header
LB: loop body
LE: loop exit
PB: predicated region body
PF: predicated region fallthrough
CT: control target
= control target key end

     0   :  { %10 = vsyncpa [#allocation3], 0  ;;  %s1264_s0 = inlined_call_operand.hbm [shape: f32[16,128], index: 0, kind: input, shape index: {}]   ;;  %s1265_s1 = inlined_call_operand.hbm [shape: f32[128,128], index: 1, kind: input, shape index: {}]   ;;  %s1266_s2 = inlined_call_operand.vmem [shape: f32[1,128], index: 2, kind: input, shape index: {}]   ;;  %s1267_s3 = inlined_call_operand.hbm [shape: f32[128,128], index: 3, kind: input, shape index: {}]   ;;  %s1268_s4 = inlined_call_operand.vmem [shape: f32[1,128], index: 4, kind: input, shape index: {}]   ;;  %s1269_s5 = inlined_call_operand.hbm [shape: f32[16,128], index: 5, kind: output, shape index: {}]  }
   0x1   :  { %12 = vsyncpa [#allocation3 + $0x1], 0 }
   0x2   :  { %13 = vsyncpa [#allocation6], 0 }
   0x3   :  { %14 = vsyncpa [#allocation4], 0 }
   0x4   :  { %16 = vsyncpa [#allocation4 + $0x1], 0  ;;  %s1006_s18 = smov 0   ;;  %s1008_s19 = smov 0  }
   0x5   :  { %s1010_s20 = smov 0   ;;  %s1012_s21 = smov 0  }
   0x6 LB: > { %s1027_s22 = sadd.s32 4294967295, %s965_s21   ;;  %s567_s23 = sadd.s32 4294967294, %s965_s21   ;;  %s965_s21 = sphi %s1012_s21, %s1289_s21   ;;  %s961_s20 = sphi %s1010_s20, %s1288_s20   ;;  %s957_s19 = sphi %s1008_s19, %s1287_s19   ;;  %s953_s18 = sphi %s1006_s18, %s1286_s18  }
   0x7   : > { %p42_p0 = scmp.ne.s32.totalorder %s957_s19, %s953_s18  ;;  %p1270_p1 = scmp.eq.s32.totalorder %s1027_s22, 0 }
   0x8   : > { %p156_p3 = scmp.eq.s32.totalorder %s567_s23, 1  ;;  %p568_p5 = scmp.ge.s32.totalorder %s965_s21, 1 }
   0x9   : > { %p1036_p4 = por %p1270_p1, %p42_p0  ;;  %p163_p7 = scmp.lt.s32.totalorder %s965_s21, 3 }
   0xa   : > { %p1041_p6 = por %p156_p3, %p42_p0  ;;  %s967_s27 = smov [#allocation5]  }
   0xb   : > { %s1273_s24 = scalar_select %p1036_p4, 1, 0 }
   0xc   : > { %s1274_s25 = scalar_select %p1041_p6, 1, 0 }
   0xd   : > { %p1046_p8 = pnand %p568_p5, %p163_p7  ;;  %s175_s28 = sshll.u32 %s967_s27, 4  ;;  %s1050_s28 = int_to_ptr.vmem [resolvable:$true] %s175_s28 }
   0xe   : > { %s968_s30 = smov [#allocation7]   ;;  %s809_s9 = scalar_lea.hbm %s1265_s1, 2048 }
   0xf   : > { %p749_p9 = pneg %p1046_p8  ;;  %s191_s6 = sshll.u32 %s968_s30, 4  ;;  %s1061_s6 = int_to_ptr.vmem [resolvable:$true] %s191_s6 }
  0x10   : > { %p810_p12 = scmp.ne.s32.totalorder %s1265_s1, %s809_s9  ;;  %p816_p5 = scmp.lt.u32.totalorder %s809_s9, %s1265_s1 }
  0x11   : > { %p1057_p11 = pnand %p749_p9, %p1270_p1 }
  0x13   : > { %p811_p13 = pneg %p1057_p11 }
  0x15   : > { %p812_p0 = pnand %p811_p13, %p810_p12 }
  0x17   : > { %p813_p3 = pneg %p812_p0 }
  0x19   : > { %p818_p7 = pnand %p816_p5, %p813_p3 }
  0x1b   : > { %821 = shalt.err (!%p818_p7)
}
  0x1c   : > { %s822_s14 = scalar_lea.vmem %s1050_s28, 2048  ;;  %p830_p2 = scmp.lt.s32.totalorder %s1050_s28, %s1050_s28 }
  0x1d   : > { %p823_p9 = scmp.ne.s32.totalorder %s1050_s28, %s822_s14  ;;  %p831_p12 = scmp.lt.s32.totalorder %s822_s14, %s822_s14 }
  0x1f   : > { %p825_p10 = pnand %p823_p9, %p811_p13  ;;  %p832_p0 = por %p831_p12, %p830_p2 }
  0x21   : > { %p826_p1 = pneg %p825_p10 }
  0x23   : > { %p833_p6 = pnand %p832_p0, %p826_p1 }
  0x25   : > { %836 = shalt.err (!%p833_p6)
}
  0x26   : > { %s969_s15 = smov 128   ;;  %s970_s16 = smov 8  }
  0x27   : > { %752 = dma.hbm_to_vmem [thread:$0]  (!%p1057_p11), %s1265_s1, 2048, %s1050_s28, [#allocation6], %s969_s15, %s969_s15, %s970_s16  }
  0x28   : > { %s837_s7 = scalar_lea.hbm %s1267_s3, 2048 }
  0x29   : > { %p838_p2 = scmp.ne.s32.totalorder %s1267_s3, %s837_s7  ;;  %p844_p10 = scmp.lt.u32.totalorder %s837_s7, %s1267_s3 }
  0x2b   : > { %p840_p1 = pnand %p838_p2, %p811_p13 }
  0x2d   : > { %p841_p6 = pneg %p840_p1 }
  0x2f   : > { %p846_p3 = pnand %p844_p10, %p841_p6 }
  0x31   : > { %849 = shalt.err (!%p846_p3)
}
  0x32   : > { %s850_s28 = scalar_lea.vmem %s1061_s6, 2048  ;;  %p858_p12 = scmp.lt.s32.totalorder %s1061_s6, %s1061_s6 }
  0x33   : > { %p851_p5 = scmp.ne.s32.totalorder %s1061_s6, %s850_s28  ;;  %p859_p0 = scmp.lt.s32.totalorder %s850_s28, %s850_s28 }
  0x35   : > { %p853_p7 = pnand %p851_p5, %p811_p13  ;;  %p860_p2 = por %p859_p0, %p858_p12 }
  0x37   : > { %p854_p9 = pneg %p853_p7 }
  0x39   : > { %p861_p1 = pnand %p860_p2, %p854_p9 }
  0x3b   : > { %864 = shalt.err (!%p861_p1)
}
  0x3c   : > { %755 = dma.hbm_to_vmem [thread:$0]  (!%p1057_p11), %s1267_s3, 2048, %s1061_s6, [#allocation6], %s969_s15, %s969_s15, %s970_s16  }
  0x3d   : > { %s1116_s14 = sadd.s32 1, %s965_s21   ;;  %s29_s29 = sadd.s32 1, %s961_s20 }
  0x3e   : > { %s26_s17 = ssub.s32 %s965_s21, %s1116_s14  ;;  %p36_p13 = scmp.ne.s32.totalorder %s961_s20, %s957_s19 }
  0x3f   : > { %p27_p6 = scmp.eq.s32.totalorder %s26_s17, 0  ;;  %p37_p10 = scmp.eq.s32.totalorder %s965_s21, 0 }
  0x40   : > { %p1277_p3 = scmp.eq.s32.totalorder %s1027_s22, 1  ;;  %p766_p7 = scmp.lt.s32.totalorder %s965_s21, 2 }
  0x41   : > { %s1132_s27 = scalar_select %p27_p6, %s961_s20, %s29_s29  }
  0x42   : > { %p1126_p5 = por %p1277_p3, %p36_p13  ;;  %p38_p9 = por %p37_p10, %p36_p13 }
  0x43   : > { %s208_s30 = sand.u32 1, %s961_s20   ;;  %s573_s6 = sshll.u32 %s965_s21, 7 }
  0x44   : > { %s1278_s23 = scalar_select %p1126_p5, 1, 0 }
  0x45   : > { %s572_s7 = sshll.u32 %s208_s30, 3  ;;  %s1139_s8 = scalar_lea.hbm %s1264_s0, %s573_s6 }
  0x46   : > { %s212_s9 = scalar_lea.vmem [#allocation2], %s572_s7  ;;  %p1143_p11 = pnand %p766_p7, %p38_p9 }
  0x47   : > { %s219_s10 = sshll.u32 %s212_s9, 4  ;;  %s209_s28 = scalar_lea.sflag [#allocation3], %s208_s30  ;;  %s1141_s10 = int_to_ptr.vmem [resolvable:$true] %s219_s10 }
  0x48   : > { %s865_s12 = scalar_lea.hbm %s1139_s8, 128  ;;  %p867_p0 = pneg %p1143_p11 }
  0x49   : > { %p866_p12 = scmp.ne.s32.totalorder %s1139_s8, %s865_s12  ;;  %s870_s17 = scalar_lea.hbm %s1264_s0, 256 }
  0x4a   : > { %p871_p13 = scmp.lt.u32.totalorder %s1139_s8, %s1264_s0  ;;  %p872_p6 = scmp.lt.u32.totalorder %s870_s17, %s865_s12 }
  0x4b   : > { %p868_p2 = pnand %p867_p0, %p866_p12  ;;  %p874_p3 = scmp.lt.u32.totalorder %s865_s12, %s1139_s8 }
  0x4c   : > { %p873_p10 = por %p872_p6, %p871_p13 }
  0x4d   : > { %p869_p1 = pneg %p868_p2 }
  0x4e   : > { %p875_p7 = por %p874_p3, %p873_p10 }
  0x50   : > { %p876_p9 = pnand %p875_p7, %p869_p1 }
  0x52   : > { %879 = shalt.err (!%p876_p9)
}
  0x53   : > { %s880_s30 = scalar_lea.vmem %s1141_s10, 128  ;;  %s971_s15 = smov [#allocation2]  }
  0x54   : > { %p881_p12 = scmp.ne.s32.totalorder %s1141_s10, %s880_s30  ;;  %s885_s16 = sshll.u32 %s971_s15, 4  ;;  %s886_s16 = int_to_ptr.vmem [resolvable:$false] %s885_s16 }
  0x55   : > { %s887_s9 = scalar_lea.vmem %s886_s16, 256  ;;  %p888_p4 = scmp.lt.s32.totalorder %s1141_s10, %s886_s16 }
  0x56   : > { %p883_p2 = pnand %p881_p12, %p867_p0  ;;  %p889_p13 = scmp.lt.s32.totalorder %s887_s9, %s880_s30 }
  0x58   : > { %p884_p5 = pneg %p883_p2  ;;  %p890_p6 = por %p889_p13, %p888_p4 }
  0x5a   : > { %p891_p10 = pnand %p890_p6, %p884_p5 }
  0x5c   : > { %894 = shalt.err (!%p891_p10)
}
  0x5d   : > { %759 = dma.hbm_to_vmem [thread:$0]  (!%p1143_p11), %s1139_s8, 128, %s1141_s10, %s209_s28  }
  0x5e   : > { %228 = sbr.rel (%p1046_p8) target bundleno = 583 (0x247), region = 40  ;;  %s1175_s12 = sand.u32 (!%p1046_p8), 1, %s957_s19  }
  0x5f   : > { %s575_s13 = sshll.u32 (!%p1046_p8), %s1175_s12, 3  ;;  %s231_s29 = scalar_lea.sflag (!%p1046_p8), [#allocation3], %s1175_s12 }
  0x60   : > { %s1181_s17 = scalar_lea.vmem (!%p1046_p8), [#allocation2], %s575_s13  ;;  %p1280_p4 = scmp.ne.s32.totalorder (!%p1046_p8), %s1273_s24, 0 }
  0x65   : > { %940 = dma.done.wait (%p1280_p4), %s231_s29, 128  }
  0x66   : > { %942 = vsyncadd (%p1280_p4), %s231_s29, 4294967168  ;;  %p1281_p5 = scmp.eq.s32.totalorder %s1027_s22, 0 }
  0x68   : > { %944 = dma.done.wait (%p1281_p5), [#allocation6], 4096   ;;  %p1282_p8 = pmov %p1281_p5 }
  0x69   : > { %v972_v0 = vmov 0.0|0.0   ;;  %vm973_vm0 = vmmov 0   ;;  %v974_v1 = vmov 0.0   ;;  %v271_v2 = vld [vmem:[#allocation5] sm:$0xff]  ;;  %v272_v3 = vld [vmem:[#allocation5 + $0x8] sm:$0xff]  ;;  %v273_v4 = vld [vmem:[#allocation5 + $0x10] sm:$0xff] }
  0x6a   : > { %946 = vsyncadd (%p1282_p8), [#allocation6], 4294963200  ;;  %689 = vmatprep.subr.bf16.mxu0 %v972_v0  ;;  %651 = vmatprep.mubr.msk.f32.mxu0 %vm973_vm0, %v974_v1  ;;  %v690_v5 = vpack.c.bf16 %v272_v3, %v271_v2  ;;  %v274_v6 = vld [vmem:[#allocation5 + $0x18] sm:$0xff]  ;;  %v275_v8 = vld [vmem:[#allocation5 + $0x20] sm:$0xff]  ;;  %s582_s11 = sshll.u32 %s1027_s22, 7  ;;  %s268_s28 = scalar_lea.vmem [#allocation8], %s575_s13 }
  0x6b   : > { %713 = vmatprep.subr.bf16.mxu1 %v972_v0  ;;  %686 = vmatprep.mubr.msk.f32.mxu1 %vm973_vm0, %v974_v1  ;;  %v693_v7 = vpack.c.bf16 %v274_v6, %v273_v4  ;;  %v276_v9 = vld [vmem:[#allocation5 + $0x28] sm:$0xff]  ;;  %v366_v10 = vld [vmem:[#allocation7] sm:$0xff]  ;;  %v368_v12 = vld [vmem:[#allocation7 + $0x10] sm:$0xff]  ;;  %s478_s7 = sshll.u32 %s268_s28, 4  ;;  %s1220_s15 = scalar_lea.hbm %s1269_s5, %s582_s11  ;;  %s1222_s7 = int_to_ptr.vmem [resolvable:$true] %s478_s7 }
  0x6c   : > { %691 = vmatpush3.bf16.msra.mxu0 %v690_v5  ;;  %v367_v11 = vld [vmem:[#allocation7 + $0x8] sm:$0xff]  ;;  %v369_v13 = vld [vmem:[#allocation7 + $0x18] sm:$0xff]  ;;  %v696_v14 = vpack.c.bf16 %v276_v9, %v275_v8  ;;  %v277_v16 = vld [vmem:[#allocation5 + $0x30] sm:$0xff]  ;;  %s465_s16 = scalar_lea.sflag [#allocation4], %s1175_s12  ;;  %s895_s9 = scalar_lea.vmem %s1222_s7, 128 }
  0x6d   : > { %692 = vmatprep.subr.bf16.mxu0 %v972_v0  ;;  %v714_v15 = vpack.c.bf16 %v367_v11, %v366_v10  ;;  %v278_v17 = vld [vmem:[#allocation5 + $0x38] sm:$0xff]  ;;  %v717_v18 = vpack.c.bf16 %v369_v13, %v368_v12  ;;  %v370_v19 = vld [vmem:[#allocation7 + $0x20] sm:$0xff]  ;;  %v371_v20 = vld [vmem:[#allocation7 + $0x28] sm:$0xff]  ;;  %p896_p11 = scmp.ne.s32.totalorder %s1222_s7, %s895_s9  ;;  %p1283_p0 = scmp.ne.s32.totalorder %s1278_s23, 0 }
  0x6e   : > { %v699_v21 = vpack.c.bf16 %v278_v17, %v277_v16  ;;  %v279_v22 = vld [vmem:[#allocation5 + $0x40] sm:$0xff]  ;;  %v280_v23 = vld [vmem:[#allocation5 + $0x48] sm:$0xff]  ;;  %v720_v24 = vpack.c.bf16 %v371_v20, %v370_v19  ;;  %v372_v25 = vld [vmem:[#allocation7 + $0x30] sm:$0xff]  ;;  %s975_s22 = smov [#allocation8]  }
  0x6f   : > { %715 = vmatpush3.bf16.msra.mxu1 %v714_v15  ;;  %v373_v26 = vld [vmem:[#allocation7 + $0x38] sm:$0xff]  ;;  %v702_v27 = vpack.c.bf16 %v280_v23, %v279_v22  ;;  %v281_v28 = vld [vmem:[#allocation5 + $0x50] sm:$0xff]  ;;  %v374_v31 = vld [vmem:[#allocation7 + $0x40] sm:$0xff]  ;;  %p897_p1 = pnand %p896_p11, %p1283_p0  ;;  %s899_s13 = sshll.u32 %s975_s22, 4  ;;  %s900_s13 = int_to_ptr.vmem [resolvable:$false] %s899_s13 }
  0x70   : > { %694 = vmatpush3.bf16.msra.mxu0 %v693_v7  ;;  %716 = vmatprep.subr.bf16.mxu1 %v972_v0  ;;  %v282_v29 = vld [vmem:[#allocation5 + $0x58] sm:$0xff]  ;;  %v723_v30 = vpack.c.bf16 %v373_v26, %v372_v25  ;;  %v375_v32 = vld [vmem:[#allocation7 + $0x48] sm:$0xff]  ;;  %v283_v34 = vld [vmem:[#allocation5 + $0x60] sm:$0xff]  ;;  %s901_s29 = scalar_lea.vmem %s900_s13, 256  ;;  %p902_p7 = scmp.lt.s32.totalorder %s1222_s7, %s900_s13 }
  0x71   : > { %695 = vmatprep.subr.bf16.mxu0 %v972_v0  ;;  %v705_v33 = vpack.c.bf16 %v282_v29, %v281_v28  ;;  %v284_v35 = vld [vmem:[#allocation5 + $0x68] sm:$0xff]  ;;  %v726_v36 = vpack.c.bf16 %v375_v32, %v374_v31  ;;  %v376_v37 = vld [vmem:[#allocation7 + $0x50] sm:$0xff]  ;;  %v377_v38 = vld [vmem:[#allocation7 + $0x58] sm:$0xff]  ;;  %p898_p3 = pneg %p897_p1  ;;  %p903_p9 = scmp.lt.s32.totalorder %s901_s29, %s895_s9 }
  0x72   : > { %v708_v39 = vpack.c.bf16 %v284_v35, %v283_v34  ;;  %v285_v40 = vld [vmem:[#allocation5 + $0x70] sm:$0xff]  ;;  %v286_v41 = vld [vmem:[#allocation5 + $0x78] sm:$0xff]  ;;  %v729_v42 = vpack.c.bf16 %v377_v38, %v376_v37  ;;  %v378_v43 = vld [vmem:[#allocation7 + $0x60] sm:$0xff] }
  0x73   : > { %718 = vmatpush3.bf16.msra.mxu1 %v717_v18  ;;  %v379_v44 = vld [vmem:[#allocation7 + $0x68] sm:$0xff]  ;;  %v711_v45 = vpack.c.bf16 %v286_v41, %v285_v40  ;;  %v270_v47 = vld [vmem:[%s1181_s17] sm:$0xff]  ;;  %p904_p12 = por %p903_p9, %p902_p7 }
  0x74   : > { %697 = vmatpush3.bf16.msra.mxu0 %v696_v14  ;;  %719 = vmatprep.subr.bf16.mxu1 %v972_v0  ;;  %v732_v46 = vpack.c.bf16 %v379_v44, %v378_v43  ;;  %v380_v48 = vld [vmem:[#allocation7 + $0x70] sm:$0xff]  ;;  %v381_v49 = vld [vmem:[#allocation7 + $0x78] sm:$0xff] }
  0x75   : > { %698 = vmatprep.subr.bf16.mxu0 %v972_v0  ;;  %v735_v50 = vpack.c.bf16 %v381_v49, %v380_v48  ;;  %v579_v51 = vld [vmem:[%s1266_s2] ss:$0 sm:$0xff]  ;;  %p905_p2 = pnand %p904_p12, %p898_p3 }
  0x76   : > { %v580_v57 = vld [vmem:[%s1268_s4] ss:$0 sm:$0xff] }
  0x77   : > { %721 = vmatpush3.bf16.msra.mxu1 %v720_v24 }
  0x78   : > { %700 = vmatpush3.bf16.msra.mxu0 %v699_v21  ;;  %722 = vmatprep.subr.bf16.mxu1 %v972_v0 }
  0x79   : > { %701 = vmatprep.subr.bf16.mxu0 %v972_v0 }
  0x7b   : > { %724 = vmatpush3.bf16.msra.mxu1 %v723_v30 }
  0x7c   : > { %703 = vmatpush3.bf16.msra.mxu0 %v702_v27  ;;  %725 = vmatprep.subr.bf16.mxu1 %v972_v0 }
  0x7d   : > { %704 = vmatprep.subr.bf16.mxu0 %v972_v0 }
  0x7f   : > { %727 = vmatpush3.bf16.msra.mxu1 %v726_v36 }
  0x80   : > { %706 = vmatpush3.bf16.msra.mxu0 %v705_v33  ;;  %728 = vmatprep.subr.bf16.mxu1 %v972_v0 }
  0x81   : > { %707 = vmatprep.subr.bf16.mxu0 %v972_v0 }
  0x83   : > { %730 = vmatpush3.bf16.msra.mxu1 %v729_v42 }
  0x84   : > { %709 = vmatpush3.bf16.msra.mxu0 %v708_v39  ;;  %731 = vmatprep.subr.bf16.mxu1 %v972_v0 }
  0x85   : > { %710 = vmatprep.subr.bf16.mxu0 %v972_v0 }
  0x87   : > { %733 = vmatpush3.bf16.msra.mxu1 %v732_v46 }
  0x88   : > { %712 = vmatpush3.bf16.msra.mxu0 %v711_v45  ;;  %734 = vmatprep.subr.bf16.mxu1 %v972_v0 }
  0x8b   : > { %652 = vmatmul.mubr.f32.vlgmr.msra.gmra.mrb[0].mxu0 %v270_v47  ;;  %736 = vmatpush3.bf16.msra.mxu1 %v735_v50 }
 0x15e   : > { %v360_v52 = vpop.f32.mrb[0].mxu0 }
 0x15f   : > { %v361_v53 = vadd.f32 %v579_v51, %v360_v52  ;;  %v653_v54 = vpop.f32.mrb[1].mxu0 }
 0x161   : > { %v364_v55 = vmax.f32 %v361_v53, 0.0 }
 0x163   : > { %687 = vmatmul.mubr.f32.vlgmr.msra.gmra.mrb[0].mxu1 %v364_v55 }
 0x236   : > { %v448_v56 = vpop.f32.mrb[0].mxu1 }
 0x237   : > { %v688_v58 = vpop.f32.mrb[1].mxu1  ;;  %v462_v59 = vadd.f32 %v580_v57, %v448_v56 }
 0x239   : > { %463 = vst [vmem:[%s268_s28] sm:$0xff] %v462_v59 }
 0x23a   : > { %908 = shalt.err (!%p905_p2)
}
 0x23b   : > { %s909_s12 = scalar_lea.hbm %s1220_s15, 128  ;;  %s913_s26 = scalar_lea.hbm %s1269_s5, 256 }
 0x23c   : > { %p910_p13 = scmp.ne.s32.totalorder %s1220_s15, %s909_s12  ;;  %p914_p4 = scmp.lt.u32.totalorder %s1220_s15, %s1269_s5 }
 0x23d   : > { %p915_p5 = scmp.lt.u32.totalorder %s913_s26, %s909_s12  ;;  %p917_p11 = scmp.lt.u32.totalorder %s909_s12, %s1220_s15 }
 0x23e   : > { %p911_p6 = pnand %p910_p13, %p1283_p0 }
 0x23f   : > { %p916_p8 = por %p915_p5, %p914_p4 }
 0x240   : > { %p912_p10 = pneg %p911_p6 }
 0x241   : > { %p918_p1 = por %p917_p11, %p916_p8 }
 0x243   : > { %p919_p3 = pnand %p918_p1, %p912_p10 }
 0x245   : > { %922 = shalt.err (!%p919_p3)
}
 0x246   : > { %747 = dma.vmem_to_hbm [thread:$0]  (%p1283_p0), %s1222_s7, 128, %s1220_s15, %s465_s16  }
 0x247 PF: > { %s490_s11 = sand.u32 1, %s953_s18   ;;  %p1284_p7 = scmp.ne.s32.totalorder %s1274_s25, 0 }
 0x248   : > { %p1285_p9 = scmp.ge.s32.totalorder %s965_s21, 2  ;;  %s491_s28 = scalar_lea.sflag [#allocation4], %s490_s11 }
 0x24a   : > { %p761_p12 = pnand %p1285_p9, %p1284_p7 }
 0x24c   : > { %948 = dma.done.wait (!%p761_p12), %s491_s28, 128  }
 0x24d   : > { %950 = vsyncadd (!%p761_p12), %s491_s28, 4294967168  ;;  %p19_p2 = scmp.ge.s32.totalorder %s1116_s14, 4   ;;  %s1286_s18 = smov %s957_s19 }
 0x24e   : > { %s1287_s19 = smov %s961_s20  ;;  %s1288_s20 = smov %s1132_s27 }
 0x24f   : > { %s1289_s21 = smov %s1116_s14  ;;  %21 = sbr.rel (!%p19_p2) target bundleno = 6 (0x6), region = 93 }
 0x256   :  { %496 = vsyncpa [#allocation3], 1 }
 0x257   :  { %498 = vsyncpa [#allocation3 + $0x1], 1 }
 0x258   :  { %499 = vsyncpa [#allocation6], 1 }
 0x259   :  { %500 = vsyncpa [#allocation4], 1 }
 0x25a   :  { %502 = vsyncpa [#allocation4 + $0x1], 1 }

</bundles_post_ra>
